<compile_context>
chip_gen: v6e
topology: v6e:2x2x1
jax: 0.10.0
libtpu: 0.0.40
codegen_flags: <defaults>
</compile_context>

<pallas_src>
import functools

import jax
import jax.numpy as jnp
from jax.experimental import pallas as pl
from jax.experimental.pallas import tpu as pltpu

WIDTH = 128  # fused lane width (actor 64 lanes + critic 64 lanes)


def policy_kernel(x_ref, w1_ref, w2_ref, w3_ref, b_ref, out_ref, *, hidden):
    """Fused actor+critic MLP: 3 wide matmuls, lane-masked activations."""
    x = x_ref[...]                                   # (B, S)

    b1 = b_ref[0:1, :]                               # (1, WIDTH)
    b2 = b_ref[1:2, :]
    b3 = b_ref[2:3, :]

    # lanes [0:hidden) -> actor (tanh), lanes [hidden:2*hidden) -> critic (relu)
    lane = jax.lax.broadcasted_iota(jnp.int32, (1, WIDTH), 1)
    actor_lane = lane < hidden

    def act(h):
        return jnp.where(actor_lane, jnp.tanh(h), jnp.maximum(h, 0.0))

    h = jnp.dot(x, w1_ref[...], preferred_element_type=jnp.float32) + b1
    h = act(h)
    h = jnp.dot(h, w2_ref[...], preferred_element_type=jnp.float32) + b2
    h = act(h)
    # Single lane-dense (B, WIDTH) store: lanes [0:A) = mean, lane A = value.
    out_ref[...] = jnp.dot(h, w3_ref[...], preferred_element_type=jnp.float32) + b3


def policy_forward(x, packed):
    """Runs the fused actor+critic MLP inside one Pallas kernel.

    Returns (action_mean (B,A), sigma (A,), value (B,1)) — the parameters of
    Normal(action_mean, sigma) plus the critic value computed by forward().
    """
    B = x.shape[0]
    H = packed["hidden"]
    A = packed["action_space"]

    vmem = pl.BlockSpec(memory_space=pltpu.MemorySpace.VMEM)

    out = pl.pallas_call(
        functools.partial(policy_kernel, hidden=H),
        out_shape=jax.ShapeDtypeStruct((B, WIDTH), jnp.float32),
        in_specs=[vmem] * 5,
        out_specs=vmem,
    )(x, packed["W1"], packed["W2"], packed["W3"], packed["b"])

    mean = out[:, :A]
    value = out[:, A:A + 1]
    # x-independent: softplus(sigma) stays in plain JAX (folded/fused by XLA).
    sigma = jax.nn.softplus(packed["sigma"])[0]
    return mean, sigma, value


def init_params(key, state_space, hidden, action_space, init_sigma=0.5):
    """Deterministic init matching Policy.init_weights:
    normal_(std=1) weights, zero biases, sigma = 0.5.
    Weights are stored pre-transposed to (in_features, out_features)."""
    ks = jax.random.split(key, 6)

    def lin(k, fan_in, fan_out):
        w = jax.random.normal(k, (fan_in, fan_out), dtype=jnp.float32)
        b = jnp.zeros((1, fan_out), dtype=jnp.float32)
        return w, b

    w1a, b1a = lin(ks[0], state_space, hidden)
    w2a, b2a = lin(ks[1], hidden, hidden)
    w3a, b3a = lin(ks[2], hidden, action_space)
    w1c, b1c = lin(ks[3], state_space, hidden)
    w2c, b2c = lin(ks[4], hidden, hidden)
    w3c, b3c = lin(ks[5], hidden, 1)
    sigma = jnp.full((1, action_space), init_sigma, dtype=jnp.float32)

    return dict(w1a=w1a, b1a=b1a, w2a=w2a, b2a=b2a, w3a=w3a, b3a=b3a,
                sigma=sigma,
                w1c=w1c, b1c=b1c, w2c=w2c, b2c=b2c, w3c=w3c, b3c=b3c)


def pack_params(p):
    """One-time host-side packing into 128-lane-dense slabs for the kernel."""
    S, H = p["w1a"].shape
    A = p["w3a"].shape[1]
    assert 2 * H <= WIDTH

    # Layer 1: [w1a | w1c]  -> (S, 128)
    W1 = jnp.zeros((S, WIDTH), jnp.float32)
    W1 = W1.at[:, :H].set(p["w1a"]).at[:, H:2 * H].set(p["w1c"])

    # Layer 2: block-diag(w2a, w2c) -> (128, 128); keeps actor/critic lanes separate.
    W2 = jnp.zeros((WIDTH, WIDTH), jnp.float32)
    W2 = W2.at[:H, :H].set(p["w2a"]).at[H:2 * H, H:2 * H].set(p["w2c"])

    # Layer 3: actor rows -> lanes [0:A), critic rows -> lane A; rest zero padding.
    W3 = jnp.zeros((WIDTH, WIDTH), jnp.float32)
    W3 = W3.at[:H, :A].set(p["w3a"]).at[H:2 * H, A:A + 1].set(p["w3c"])

    # Biases: one (3, 128) slab, one row per layer.
    b = jnp.zeros((3, WIDTH), jnp.float32)
    b = b.at[0, :H].set(p["b1a"][0]).at[0, H:2 * H].set(p["b1c"][0])
    b = b.at[1, :H].set(p["b2a"][0]).at[1, H:2 * H].set(p["b2c"][0])
    b = b.at[2, :A].set(p["b3a"][0]).at[2, A:A + 1].set(p["b3c"][0])

    return dict(W1=W1, W2=W2, W3=W3, b=b, sigma=p["sigma"],
                hidden=H, action_space=A)


def reference_forward(x, p):
    """Plain-JAX reference matching the PyTorch forward."""
    h = jnp.tanh(x @ p["w1a"] + p["b1a"])
    h = jnp.tanh(h @ p["w2a"] + p["b2a"])
    mean = h @ p["w3a"] + p["b3a"]
    sigma = jax.nn.softplus(p["sigma"])[0]
    c = jax.nn.relu(x @ p["w1c"] + p["b1c"])
    c = jax.nn.relu(c @ p["w2c"] + p["b2c"])
    value = c @ p["w3c"] + p["b3c"]
    return mean, sigma, value


if __name__ == "__main__":
    STATE_SPACE = 16
    ACTION_SPACE = 4
    HIDDEN = 64
    BATCH = 8

    key = jax.random.PRNGKey(0)
    k_param, k_x = jax.random.split(key)

    params = init_params(k_param, STATE_SPACE, HIDDEN, ACTION_SPACE)
    packed = pack_params(params)            # one-time host-side packing
    x = jax.random.normal(k_x, (BATCH, STATE_SPACE), dtype=jnp.float32)

    mean, sigma, value = policy_forward(x, packed)
    jax.block_until_ready((mean, sigma, value))

    # correctness check vs pure-JAX reference on the unpacked params
    ref_mean, ref_sigma, ref_value = reference_forward(x, params)
    assert jnp.allclose(mean, ref_mean, atol=1e-4, rtol=1e-4)
    assert jnp.allclose(sigma, ref_sigma, atol=1e-6, rtol=1e-6)
    assert jnp.allclose(value, ref_value, atol=1e-4, rtol=1e-4)

    # Normal(action_mean, sigma) is fully determined by (mean, sigma);
    # torch.distributions.Normal itself has no Pallas equivalent — we return its params.
    print("KERNEL_OK")
</pallas_src>

<mosaic_0001>
module attributes {stable_mosaic.version = 11 : i64} {
  func.func @policy_kernel(%arg0: memref<8x16xf32, #tpu.memory_space<vmem>>, %arg1: memref<16x128xf32, #tpu.memory_space<vmem>>, %arg2: memref<128x128xf32, #tpu.memory_space<vmem>>, %arg3: memref<128x128xf32, #tpu.memory_space<vmem>>, %arg4: memref<3x128xf32, #tpu.memory_space<vmem>>, %arg5: memref<8x128xf32, #tpu.memory_space<vmem>>) attributes {dimension_semantics = [], scalar_prefetch = 0 : i64, scratch_operands = 0 : i64, tpu.core_type = #tpu.core_type<tc>} {
    %c0 = arith.constant 0 : index
    %c0_0 = arith.constant 0 : index
    %0 = vector.load %arg0[%c0, %c0_0] : memref<8x16xf32, #tpu.memory_space<vmem>>, vector<8x16xf32>
    %c0_1 = arith.constant 0 : index
    %c0_2 = arith.constant 0 : index
    %1 = vector.load %arg4[%c0_1, %c0_2] : memref<3x128xf32, #tpu.memory_space<vmem>>, vector<1x128xf32>
    %c1 = arith.constant 1 : index
    %c0_3 = arith.constant 0 : index
    %2 = vector.load %arg4[%c1, %c0_3] : memref<3x128xf32, #tpu.memory_space<vmem>>, vector<1x128xf32>
    %c2 = arith.constant 2 : index
    %c0_4 = arith.constant 0 : index
    %3 = vector.load %arg4[%c2, %c0_4] : memref<3x128xf32, #tpu.memory_space<vmem>>, vector<1x128xf32>
    %4 = tpu.iota {dimensions = array<i32: 1>} : vector<1x128xi32>
    %c64_i32 = arith.constant 64 : i32
    %5 = vector.broadcast %c64_i32 : i32 to vector<1x128xi32>
    %6 = arith.cmpi slt, %4, %5 : vector<1x128xi32>
    %c0_5 = arith.constant 0 : index
    %c0_6 = arith.constant 0 : index
    %7 = vector.load %arg1[%c0_5, %c0_6] : memref<16x128xf32, #tpu.memory_space<vmem>>, vector<16x128xf32>
    %cst = arith.constant dense<0.000000e+00> : vector<8x128xf32>
    %8 = tpu.matmul %0, %7, %cst {dimension_numbers = #tpu.dot_dimension_numbers<[1], [0], [0], [1], [0, 0, 1, 1], [], []>} : vector<8x16xf32>, vector<16x128xf32>, vector<8x128xf32> -> vector<8x128xf32>
    %9 = vector.broadcast %1 : vector<1x128xf32> to vector<8x128xf32>
    %10 = arith.addf %8, %9 : vector<8x128xf32>
    %11 = math.tanh %10 : vector<8x128xf32>
    %cst_7 = arith.constant 0.000000e+00 : f32
    %12 = vector.broadcast %cst_7 : f32 to vector<8x128xf32>
    %13 = arith.maximumf %10, %12 : vector<8x128xf32>
    %14 = vector.shape_cast %6 : vector<1x128xi1> to vector<1x128xi1>
    %15 = vector.broadcast %14 : vector<1x128xi1> to vector<8x128xi1>
    %16 = arith.select %15, %11, %13 : vector<8x128xi1>, vector<8x128xf32>
    %c0_8 = arith.constant 0 : index
    %c0_9 = arith.constant 0 : index
    %17 = vector.load %arg2[%c0_8, %c0_9] : memref<128x128xf32, #tpu.memory_space<vmem>>, vector<128x128xf32>
    %cst_10 = arith.constant dense<0.000000e+00> : vector<8x128xf32>
    %18 = tpu.matmul %16, %17, %cst_10 {dimension_numbers = #tpu.dot_dimension_numbers<[1], [0], [0], [1], [0, 0, 1, 1], [], []>} : vector<8x128xf32>, vector<128x128xf32>, vector<8x128xf32> -> vector<8x128xf32>
    %19 = vector.broadcast %2 : vector<1x128xf32> to vector<8x128xf32>
    %20 = arith.addf %18, %19 : vector<8x128xf32>
    %21 = math.tanh %20 : vector<8x128xf32>
    %cst_11 = arith.constant 0.000000e+00 : f32
    %22 = vector.broadcast %cst_11 : f32 to vector<8x128xf32>
    %23 = arith.maximumf %20, %22 : vector<8x128xf32>
    %24 = vector.shape_cast %6 : vector<1x128xi1> to vector<1x128xi1>
    %25 = vector.broadcast %24 : vector<1x128xi1> to vector<8x128xi1>
    %26 = arith.select %25, %21, %23 : vector<8x128xi1>, vector<8x128xf32>
    %c0_12 = arith.constant 0 : index
    %c0_13 = arith.constant 0 : index
    %27 = vector.load %arg3[%c0_12, %c0_13] : memref<128x128xf32, #tpu.memory_space<vmem>>, vector<128x128xf32>
    %cst_14 = arith.constant dense<0.000000e+00> : vector<8x128xf32>
    %28 = tpu.matmul %26, %27, %cst_14 {dimension_numbers = #tpu.dot_dimension_numbers<[1], [0], [0], [1], [0, 0, 1, 1], [], []>} : vector<8x128xf32>, vector<128x128xf32>, vector<8x128xf32> -> vector<8x128xf32>
    %29 = vector.broadcast %3 : vector<1x128xf32> to vector<8x128xf32>
    %30 = arith.addf %28, %29 : vector<8x128xf32>
    %c0_15 = arith.constant 0 : index
    %c0_16 = arith.constant 0 : index
    %31 = vector.load %arg5[%c0_15, %c0_16] : memref<8x128xf32, #tpu.memory_space<vmem>>, vector<8x128xf32>
    tpu.vector_store %arg5[%c0_15, %c0_16], %30 {strides = array<i32>} : memref<8x128xf32, #tpu.memory_space<vmem>>, vector<8x128xf32>,
    return
  }
}

</mosaic_0001>

<bundles_post_ra>
// kernel: tpu_custom_call.1
= control target key start
LH: loop header
LB: loop body
LE: loop exit
PB: predicated region body
PF: predicated region fallthrough
CT: control target
= control target key end

     0   :  { %10 = vsyncpa [#allocation3], 0  ;;  %s720_s0 = inlined_call_operand.hbm [shape: f32[8,16], index: 0, kind: input, shape index: {}]   ;;  %s721_s1 = inlined_call_operand.hbm [shape: f32[16,128], index: 1, kind: input, shape index: {}]   ;;  %s722_s2 = inlined_call_operand.hbm [shape: f32[128,128], index: 2, kind: input, shape index: {}]   ;;  %s723_s3 = inlined_call_operand.hbm [shape: f32[128,128], index: 3, kind: input, shape index: {}]   ;;  %s724_s4 = inlined_call_operand.vmem [shape: f32[3,128], index: 4, kind: input, shape index: {}]   ;;  %s725_s5 = inlined_call_operand.hbm [shape: f32[8,128], index: 5, kind: output, shape index: {}]  }
   0x1   :  { %11 = vsyncpa [#allocation6], 0 }
   0x2   :  { %12 = vsyncpa [#allocation9], 0 }
   0x3   :  { %13 = vsyncpa [#allocation4], 0  ;;  %s606_s18 = smov [#allocation5]  }
   0x4   :  { %s29_s19 = sshll.u32 %s606_s18, 4  ;;  %s30_s19 = int_to_ptr.vmem [resolvable:$true] %s29_s19 }
   0x5   :  { %s506_s20 = scalar_lea.vmem %s30_s19, 256  ;;  %p511_p1 = scmp.lt.s32.totalorder %s30_s19, %s30_s19 }
   0x6   :  { %p507_p0 = scmp.ne.s32.totalorder %s30_s19, %s506_s20  ;;  %p512_p2 = scmp.lt.s32.totalorder %s506_s20, %s506_s20 }
   0x8   :  { %p513_p3 = por %p512_p2, %p511_p1 }
   0xa   :  { %p514_p4 = pnand %p513_p3, %p507_p0 }
   0xc   :  { %517 = shalt.err (!%p514_p4)
}
   0xd   :  { %s607_s21 = smov 128   ;;  %s608_s22 = smov 8  }
   0xe   :  { %35 = dma.hbm_to_vmem [thread:$0]  %s721_s1, 256, %s30_s19, [#allocation6], %s607_s21, %s607_s21, %s608_s22  }
   0xf   :  { %s609_s25 = smov [#allocation2]   ;;  %s610_s27 = smov [#allocation7]  }
  0x10   :  { %s20_s26 = sshll.u32 %s609_s25, 4  ;;  %s41_s28 = sshll.u32 %s610_s27, 4  ;;  %s21_s26 = int_to_ptr.vmem [resolvable:$true] %s20_s26  ;;  %s42_s28 = int_to_ptr.vmem [resolvable:$true] %s41_s28 }
  0x11   :  { %s526_s29 = scalar_lea.vmem %s21_s26, 128  ;;  %p531_p6 = scmp.lt.s32.totalorder %s21_s26, %s21_s26 }
  0x12   :  { %p527_p5 = scmp.ne.s32.totalorder %s21_s26, %s526_s29  ;;  %p532_p7 = scmp.lt.s32.totalorder %s526_s29, %s526_s29 }
  0x14   :  { %p533_p8 = por %p532_p7, %p531_p6 }
  0x16   :  { %p534_p9 = pnand %p533_p8, %p527_p5 }
  0x18   :  { %537 = shalt.err (!%p534_p9)
}
  0x19   :  { %23 = dma.hbm_to_vmem [thread:$0]  %s720_s0, 128, %s21_s26, [#allocation3]  }
  0x1a   :  { %s546_s7 = scalar_lea.vmem %s42_s28, 2048  ;;  %p551_p11 = scmp.lt.s32.totalorder %s42_s28, %s42_s28 }
  0x1b   :  { %p547_p10 = scmp.ne.s32.totalorder %s42_s28, %s546_s7  ;;  %p552_p12 = scmp.lt.s32.totalorder %s546_s7, %s546_s7 }
  0x1d   :  { %p553_p13 = por %p552_p12, %p551_p11 }
  0x1f   :  { %p554_p0 = pnand %p553_p13, %p547_p10 }
  0x21   :  { %557 = shalt.err (!%p554_p0)
}
  0x22   :  { %47 = dma.hbm_to_vmem [thread:$0]  %s722_s2, 2048, %s42_s28, [#allocation6], %s607_s21, %s607_s21, %s608_s22  }
  0x23   :  { %s611_s9 = smov [#allocation8]  }
  0x24   :  { %s53_s10 = sshll.u32 %s611_s9, 4  ;;  %s54_s10 = int_to_ptr.vmem [resolvable:$true] %s53_s10 }
  0x25   :  { %s566_s11 = scalar_lea.vmem %s54_s10, 2048  ;;  %p571_p2 = scmp.lt.s32.totalorder %s54_s10, %s54_s10 }
  0x26   :  { %p567_p1 = scmp.ne.s32.totalorder %s54_s10, %s566_s11  ;;  %p572_p3 = scmp.lt.s32.totalorder %s566_s11, %s566_s11 }
  0x28   :  { %p573_p4 = por %p572_p3, %p571_p2 }
  0x2a   :  { %p574_p5 = pnand %p573_p4, %p567_p1 }
  0x2c   :  { %577 = shalt.err (!%p574_p5)
}
  0x2d   :  { %59 = dma.hbm_to_vmem [thread:$0]  %s723_s3, 2048, %s54_s10, [#allocation9], %s607_s21, %s607_s21, %s608_s22  }
  0x2e   :  { %598 = dma.done.wait [#allocation3], 128  }
  0x2f   :  { %599 = vsyncadd [#allocation3], 4294967168 }
  0x30   :  { %600 = dma.done.wait [#allocation6], 2304  }
  0x31   :  { %601 = vsyncadd [#allocation6], 4294964992 }
  0x32   :  { %602 = dma.done.wait [#allocation9], 2048  }
  0x33   :  { %603 = vsyncadd [#allocation9], 4294965248  ;;  %v612_v0 = vmov 0.0   ;;  %vm613_vm0 = vmmov 0   ;;  %v82_v1 = vld [vmem:[#allocation5 + $0x8] sm:$0xff]  ;;  %v81_v2 = vld [vmem:[#allocation5] sm:$0xff]  ;;  %v78_v31 = vlaneseq }
  0x34   :  { %408 = vmatprep.subr.mxu0 %v612_v0  ;;  %412 = vmatprep.mubr.msk.f32.mxu0 %vm613_vm0, %v612_v0  ;;  %v74_v3 = vld [vmem:[#allocation2] sm:$0xff]  ;;  %vm87_vm1 = vcmask 130048   ;;  %v181_v4 = vld [vmem:[#allocation7 + $0x78] sm:$0xff]  ;;  %v180_v5 = vld [vmem:[#allocation7 + $0x70] sm:$0xff]  ;;  %s614_s17 = smov [#allocation10]  }
  0x35   :  { %415 = vmatprep.subr.mxu1 %v612_v0  ;;  %447 = vmatprep.mubr.msk.f32.mxu1 %vm613_vm0, %v612_v0  ;;  %v179_v6 = vld [vmem:[#allocation7 + $0x68] sm:$0xff]  ;;  %v178_v7 = vld [vmem:[#allocation7 + $0x60] sm:$0xff]  ;;  %v177_v8 = vld [vmem:[#allocation7 + $0x58] sm:$0xff]  ;;  %v79_v32 = vand.u32 127, %v78_v31  ;;  %s356_s18 = sshll.u32 %s614_s17, 4  ;;  %s357_s18 = int_to_ptr.vmem [resolvable:$true] %s356_s18 }
  0x36   :  { %409 = vmatpush3.msra.mxu0 %v82_v1  ;;  %416 = vmatpush3.msra.mxu1 %v181_v4  ;;  %v176_v9 = vld [vmem:[#allocation7 + $0x50] sm:$0xff]  ;;  %v175_v10 = vld [vmem:[#allocation7 + $0x48] sm:$0xff]  ;;  %v174_v11 = vld [vmem:[#allocation7 + $0x40] sm:$0xff]  ;;  %s578_s19 = scalar_lea.vmem %s357_s18, 128  ;;  %p583_p7 = scmp.lt.s32.totalorder %s357_s18, %s357_s18 }
  0x37   :  { %410 = vmatprep.subr.mxu0 %v612_v0  ;;  %417 = vmatprep.subr.mxu1 %v612_v0  ;;  %v173_v12 = vld [vmem:[#allocation7 + $0x38] sm:$0xff]  ;;  %v172_v13 = vld [vmem:[#allocation7 + $0x30] sm:$0xff]  ;;  %v171_v14 = vld [vmem:[#allocation7 + $0x28] sm:$0xff]  ;;  %vm80_vm2 = vcmp.lt.s32.totalorder %v79_v32, 64  ;;  %p579_p6 = scmp.ne.s32.totalorder %s357_s18, %s578_s19  ;;  %p584_p8 = scmp.lt.s32.totalorder %s578_s19, %s578_s19 }
  0x38   :  { %411 = vmatpush3.msra.mxu0 %v81_v2  ;;  %418 = vmatpush3.msra.mxu1 %v180_v5  ;;  %v170_v15 = vld [vmem:[#allocation7 + $0x20] sm:$0xff]  ;;  %v169_v16 = vld [vmem:[#allocation7 + $0x18] sm:$0xff]  ;;  %v168_v17 = vld [vmem:[#allocation7 + $0x10] sm:$0xff] }
  0x39   :  { %413 = vmatmul.mubr.msk.f32.vlgmr.msra.gmra.mxu0 %vm87_vm1, %v74_v3  ;;  %419 = vmatprep.subr.mxu1 %v612_v0  ;;  %v167_v18 = vld [vmem:[#allocation7 + $0x8] sm:$0xff]  ;;  %v166_v19 = vld [vmem:[#allocation7] sm:$0xff]  ;;  %v274_v20 = vld [vmem:[#allocation8 + $0x78] sm:$0xff]  ;;  %p585_p9 = por %p584_p8, %p583_p7 }
  0x3a   :  { %450 = vmatprep.subr.mxu0 %v612_v0  ;;  %420 = vmatpush3.msra.mxu1 %v179_v6  ;;  %v273_v21 = vld [vmem:[#allocation8 + $0x70] sm:$0xff]  ;;  %v272_v22 = vld [vmem:[#allocation8 + $0x68] sm:$0xff]  ;;  %v271_v23 = vld [vmem:[#allocation8 + $0x60] sm:$0xff] }
  0x3b   :  { %482 = vmatprep.mubr.msk.f32.mxu0 %vm613_vm0, %v612_v0  ;;  %421 = vmatprep.subr.mxu1 %v612_v0  ;;  %v270_v24 = vld [vmem:[#allocation8 + $0x58] sm:$0xff]  ;;  %v269_v25 = vld [vmem:[#allocation8 + $0x50] sm:$0xff]  ;;  %v268_v26 = vld [vmem:[#allocation8 + $0x48] sm:$0xff]  ;;  %p586_p10 = pnand %p585_p9, %p579_p6 }
  0x3c   :  { %422 = vmatpush3.msra.mxu1 %v178_v7  ;;  %451 = vmatpush3.msra.mxu0 %v274_v20  ;;  %v367_v27 = vld [vmem:[%s724_s4] ss:$0 sm:$0xff]  ;;  %v267_v36 = vld [vmem:[#allocation8 + $0x40] sm:$0xff]  ;;  %v266_v37 = vld [vmem:[#allocation8 + $0x38] sm:$0xff] }
  0x3d   :  { %423 = vmatprep.subr.mxu1 %v612_v0  ;;  %452 = vmatprep.subr.mxu0 %v612_v0  ;;  %v265_v38 = vld [vmem:[#allocation8 + $0x30] sm:$0xff]  ;;  %v264_v39 = vld [vmem:[#allocation8 + $0x28] sm:$0xff]  ;;  %v263_v40 = vld [vmem:[#allocation8 + $0x20] sm:$0xff] }
  0x3e   :  { %424 = vmatpush3.msra.mxu1 %v177_v8  ;;  %453 = vmatpush3.msra.mxu0 %v273_v21  ;;  %v262_v41 = vld [vmem:[#allocation8 + $0x18] sm:$0xff]  ;;  %v261_v42 = vld [vmem:[#allocation8 + $0x10] sm:$0xff]  ;;  %v260_v43 = vld [vmem:[#allocation8 + $0x8] sm:$0xff] }
  0x3f   :  { %425 = vmatprep.subr.mxu1 %v612_v0  ;;  %454 = vmatprep.subr.mxu0 %v612_v0  ;;  %v259_v44 = vld [vmem:[#allocation8] sm:$0xff]  ;;  %v369_v45 = vld [vmem:[%s724_s4 + $0x1] ss:$0 sm:$0xff]  ;;  %v370_v52 = vld [vmem:[%s724_s4 + $0x2] ss:$0 sm:$0xff] }
  0x40   :  { %426 = vmatpush3.msra.mxu1 %v176_v9  ;;  %455 = vmatpush3.msra.mxu0 %v272_v22 }
  0x41   :  { %427 = vmatprep.subr.mxu1 %v612_v0  ;;  %456 = vmatprep.subr.mxu0 %v612_v0 }
  0x42   :  { %428 = vmatpush3.msra.mxu1 %v175_v10  ;;  %457 = vmatpush3.msra.mxu0 %v271_v23 }
  0x43   :  { %429 = vmatprep.subr.mxu1 %v612_v0  ;;  %458 = vmatprep.subr.mxu0 %v612_v0 }
  0x44   :  { %430 = vmatpush3.msra.mxu1 %v174_v11  ;;  %459 = vmatpush3.msra.mxu0 %v270_v24 }
  0x45   :  { %431 = vmatprep.subr.mxu1 %v612_v0  ;;  %460 = vmatprep.subr.mxu0 %v612_v0 }
  0x46   :  { %432 = vmatpush3.msra.mxu1 %v173_v12  ;;  %461 = vmatpush3.msra.mxu0 %v269_v25 }
  0x47   :  { %433 = vmatprep.subr.mxu1 %v612_v0  ;;  %462 = vmatprep.subr.mxu0 %v612_v0 }
  0x48   :  { %434 = vmatpush3.msra.mxu1 %v172_v13  ;;  %463 = vmatpush3.msra.mxu0 %v268_v26 }
  0x49   :  { %435 = vmatprep.subr.mxu1 %v612_v0  ;;  %464 = vmatprep.subr.mxu0 %v612_v0 }
  0x4a   :  { %436 = vmatpush3.msra.mxu1 %v171_v14  ;;  %465 = vmatpush3.msra.mxu0 %v267_v36 }
  0x4b   :  { %437 = vmatprep.subr.mxu1 %v612_v0  ;;  %466 = vmatprep.subr.mxu0 %v612_v0 }
  0x4c   :  { %438 = vmatpush3.msra.mxu1 %v170_v15  ;;  %467 = vmatpush3.msra.mxu0 %v266_v37 }
  0x4d   :  { %439 = vmatprep.subr.mxu1 %v612_v0  ;;  %468 = vmatprep.subr.mxu0 %v612_v0 }
  0x4e   :  { %440 = vmatpush3.msra.mxu1 %v169_v16  ;;  %469 = vmatpush3.msra.mxu0 %v265_v38 }
  0x4f   :  { %441 = vmatprep.subr.mxu1 %v612_v0  ;;  %470 = vmatprep.subr.mxu0 %v612_v0 }
  0x50   :  { %442 = vmatpush3.msra.mxu1 %v168_v17  ;;  %471 = vmatpush3.msra.mxu0 %v264_v39 }
  0x51   :  { %443 = vmatprep.subr.mxu1 %v612_v0  ;;  %472 = vmatprep.subr.mxu0 %v612_v0 }
  0x52   :  { %444 = vmatpush3.msra.mxu1 %v167_v18  ;;  %473 = vmatpush3.msra.mxu0 %v263_v40 }
  0x53   :  { %445 = vmatprep.subr.mxu1 %v612_v0  ;;  %474 = vmatprep.subr.mxu0 %v612_v0 }
  0x54   :  { %446 = vmatpush3.msra.mxu1 %v166_v19  ;;  %475 = vmatpush3.msra.mxu0 %v262_v41 }
  0x55   :  { %476 = vmatprep.subr.mxu0 %v612_v0 }
  0x56   :  { %477 = vmatpush3.msra.mxu0 %v261_v42 }
  0x57   :  { %478 = vmatprep.subr.mxu0 %v612_v0 }
  0x58   :  { %479 = vmatpush3.msra.mxu0 %v260_v43 }
  0x59   :  { %480 = vmatprep.subr.mxu0 %v612_v0 }
  0x5a   :  { %481 = vmatpush3.msra.mxu0 %v259_v44 }
  0xf9   :  { %v157_v28 = vpop.f32.mrf.mxu0 }
  0xfa   :  { %v158_v29 = vadd.f32 %v367_v27, %v157_v28 }
  0xfb   :  { %v414_v30 = vpop.f32.mrf.mxu0 }
  0xfc   :  { %494 = vtanh.f32 %v158_v29  ;;  %v162_v33 = vmax.f32 %v158_v29, 0.0 }
 0x109   :  { %v495_v34 = vpop.eup %494 }
 0x10a   :  { %v165_v35 = vsel %vm80_vm2, %v495_v34, %v162_v33 }
 0x10b   :  { %448 = vmatmul.mubr.f32.vlgmr.msra.gmra.mxu1 %v165_v35 }
 0x1cb   :  { %v252_v46 = vpop.f32.mrf.mxu1 }
 0x1cc   :  { %v253_v47 = vadd.f32 %v369_v45, %v252_v46 }
 0x1cd   :  { %v449_v48 = vpop.f32.mrf.mxu1 }
 0x1ce   :  { %496 = vtanh.f32 %v253_v47  ;;  %v257_v49 = vmax.f32 %v253_v47, 0.0 }
 0x1db   :  { %v497_v50 = vpop.eup %496 }
 0x1dc   :  { %v258_v51 = vsel %vm80_vm2, %v497_v50, %v257_v49 }
 0x1dd   :  { %483 = vmatmul.mubr.f32.vlgmr.msra.gmra.mxu0 %v258_v51 }
 0x29d   :  { %v345_v53 = vpop.f32.mrf.mxu0 }
 0x29e   :  { %v346_v54 = vadd.f32 %v370_v52, %v345_v53 }
 0x29f   :  { %v484_v55 = vpop.f32.mrf.mxu0 }
 0x2a0   :  { %349 = vst [vmem:[#allocation10] sm:$0xff] %v346_v54 }
 0x2a1   :  { %589 = shalt.err (!%p586_p10)
}
 0x2a2   :  { %359 = dma.vmem_to_hbm [thread:$0]  %s357_s18, 128, %s725_s5, [#allocation4]  }
 0x2a3   :  { %604 = dma.done.wait [#allocation4], 128  }
 0x2a4   :  { %605 = vsyncadd [#allocation4], 4294967168 }
 0x2a5   :  { %363 = vsyncpa [#allocation3], 1 }
 0x2a6   :  { %364 = vsyncpa [#allocation6], 1 }
 0x2a7   :  { %365 = vsyncpa [#allocation9], 1 }
 0x2a8   :  { %366 = vsyncpa [#allocation4], 1 }

</bundles_post_ra>
